<compile_context>
chip_gen: v5e
topology: v5e:2x2
jax: 0.10.0
libtpu: 0.0.40
codegen_flags: <defaults>
</compile_context>

<pallas_src>
import functools

import jax
import jax.numpy as jnp
from jax import lax
from jax.experimental import pallas as pl
from jax.experimental.pallas import tpu as pltpu


def _rnd_up(x, m):
    return ((x + m - 1) // m) * m


def _largest_divisor(n, pred):
    best = 1
    for d in range(1, n + 1):
        if n % d == 0 and pred(d):
            best = d
    return best


def _conv_bn_relu_kernel(x_ref, w_ref, scale_ref, shift_ref, o_ref, *,
                         KH, stride, dilation):
    # x_ref:     (NB, H_pad, OW, KW*Cin) bf16  width-expanded input (im2col over kw only)
    # w_ref:     (KH, KW*Cin, TN)        bf16  per-height-tap weight block
    # scale_ref: (1, TN)                 f32   folded BN scale
    # shift_ref: (1, TN)                 f32   folded BN shift
    # o_ref:     (NB, OH_t, OW, TN)      f32   output row tile
    NB, OH_t, OW, TN = o_ref.shape
    KWC = x_ref.shape[-1]
    M = NB * OH_t * OW

    r = pl.program_id(2)                 # output-row-tile index (grid = (nb, nj, nr))
    row0 = r * (OH_t * stride)

    acc = jnp.zeros((M, TN), jnp.float32)
    for kh in range(KH):
        start = row0 + kh * dilation
        if stride == 1:
            xs = x_ref[:, pl.ds(start, OH_t), :, :]
        else:
            # TODO(synk): for stride>1, a wrapper-side row phase split would make this a
            # dense slice; strided leading-dim addressing is kept here for generality.
            xs = x_ref[:, pl.ds(start, OH_t, stride), :, :]
        lhs = xs.reshape(M, KWC)         # merges leading dims only; minor (lane) dim kept
        acc = acc + jnp.dot(lhs, w_ref[kh], preferred_element_type=jnp.float32)

    y = jnp.maximum(acc * scale_ref[...] + shift_ref[...], 0.0)
    o_ref[...] = y.reshape(NB, OH_t, OW, TN).astype(o_ref.dtype)


def basic_conv2d_relu(x_nchw, weight, gamma, beta, running_mean, running_var,
                      *, stride=1, padding=0, dilation=1, eps=1e-5):
    """Forward pass of BasicConv2dReLu (conv bias=False, BatchNorm2d eval mode, ReLU).

    x_nchw: (N, Cin, H, W) f32; weight: (Cout, Cin, KH, KW) f32 (PyTorch OIHW layout);
    gamma/beta/running_mean/running_var: (Cout,) f32.
    """
    N, Cin, H, W = (int(d) for d in x_nchw.shape)
    Cout, _, KH, KW = (int(d) for d in weight.shape)

    OH = (H + 2 * padding - dilation * (KH - 1) - 1) // stride + 1
    OW = (W + 2 * padding - dilation * (KW - 1) - 1) // stride + 1
    H_pad = H + 2 * padding
    KWC = KW * Cin

    # ---- Cout tiling (matmul N dim / output channel dim) ---------------------------------
    if Cout <= 256:
        TN, Coutp = Cout, Cout          # unpadded: no write amplification for small Cout
    else:
        Coutp = _rnd_up(Cout, 128)
        TN = 256 if Coutp % 256 == 0 else 128   # 256-wide MXU on v6e/v7x
    n_j = Coutp // TN

    # ---- input: NCHW -> NHWC bf16, spatial pad, width-only im2col (lane-dense minor) -----
    x = jnp.transpose(x_nchw, (0, 2, 3, 1)).astype(jnp.bfloat16)
    x = jnp.pad(x, ((0, 0), (padding, padding), (padding, padding), (0, 0)))
    cols = [lax.slice_in_dim(x, kw * dilation, kw * dilation + (OW - 1) * stride + 1,
                             stride=stride, axis=2) for kw in range(KW)]
    x_exp = cols[0] if KW == 1 else jnp.concatenate(cols, axis=-1)   # (N, H_pad, OW, KWC)

    # ---- weights: (Cout, Cin, KH, KW) -> (KH, KW*Cin, Coutp) bf16, tap-aligned leading dim
    w = jnp.transpose(weight, (2, 3, 1, 0)).reshape(KH, KWC, Cout)
    if Coutp != Cout:
        w = jnp.pad(w, ((0, 0), (0, 0), (0, Coutp - Cout)))
    w = w.astype(jnp.bfloat16)

    # ---- fold BN (eval mode, running stats) into per-channel scale / shift (f32) ---------
    scale = (gamma / jnp.sqrt(running_var + eps)).astype(jnp.float32)
    shift = beta.astype(jnp.float32) - running_mean.astype(jnp.float32) * scale
    if Coutp != Cout:
        scale = jnp.pad(scale, (0, Coutp - Cout))
        shift = jnp.pad(shift, (0, Coutp - Cout))
    scale2d = scale.reshape(1, Coutp)
    shift2d = shift.reshape(1, Coutp)

    # ---- blocking: batch block for MXU M-fill, row tiles to bound the f32 accumulator ----
    TNp = _rnd_up(TN, 128)
    NB = _largest_divisor(N, lambda d: d * OH * OW <= 2048)
    OH_t = _largest_divisor(OH, lambda d: NB * d * OW * TNp * 4 <= (1 << 20))
    n_r = OH // OH_t
    M = NB * OH_t * OW

    kernel = functools.partial(_conv_bn_relu_kernel, KH=KH, stride=stride, dilation=dilation)

    # ---- VMEM budget with (sublane, lane)-padded footprints, double-buffered -------------
    in_blk = NB * H_pad * _rnd_up(OW, 16) * _rnd_up(KWC, 128) * 2        # bf16
    w_blk = KH * _rnd_up(KWC, 16) * _rnd_up(TN, 128) * 2                 # bf16
    sc_blk = 2 * 8 * _rnd_up(TN, 128) * 4                                # f32 scale + shift
    out_blk = NB * OH_t * _rnd_up(OW, 8) * _rnd_up(TN, 128) * 4          # f32
    scratch = M * (_rnd_up(KWC, 128) * 2 + _rnd_up(TN, 128) * 4)         # lhs slab + acc
    needed = 2 * (in_blk + w_blk + sc_blk + out_blk) + 2 * scratch
    try:
        vmem_cap = int(pltpu.get_tpu_info().vmem_capacity_bytes)
    except Exception:
        vmem_cap = 64 * 1024 * 1024                                      # conservative (v7x)
    vmem_limit = int(min(max(2 * needed, 32 * 1024 * 1024), int(vmem_cap * 0.75)))

    cost = pl.CostEstimate(
        flops=2 * N * OH * OW * KH * KW * Cin * Cout,
        transcendentals=0,
        bytes_accessed=int(N * H_pad * OW * KWC * 2              # input (resident across j, r)
                           + (N // NB) * KH * KWC * Coutp * 2    # weight refetch per batch block
                           + 2 * Coutp * 4                       # scale / shift
                           + N * OH * OW * Coutp * 4),           # output writeback
    )

    # TODO(synk): for very large feature maps the full-height input block stays VMEM-resident;
    # a halo'd row-block fetched via manual make_async_copy double-buffering would bound the
    # input footprint as well (matters mostly on v7x's 64 MiB VMEM).
    out = pl.pallas_call(
        kernel,
        out_shape=jax.ShapeDtypeStruct((N, OH, OW, Coutp), jnp.float32),
        grid_spec=pltpu.PrefetchScalarGridSpec(
            num_scalar_prefetch=0,
            grid=(N // NB, n_j, n_r),
            in_specs=[
                pl.BlockSpec((NB, H_pad, OW, KWC), lambda b, j, r: (b, 0, 0, 0)),
                pl.BlockSpec((KH, KWC, TN), lambda b, j, r: (0, 0, j)),
                pl.BlockSpec((1, TN), lambda b, j, r: (0, j)),
                pl.BlockSpec((1, TN), lambda b, j, r: (0, j)),
            ],
            out_specs=pl.BlockSpec((NB, OH_t, OW, TN), lambda b, j, r: (b, r, 0, j)),
        ),
        compiler_params=pltpu.CompilerParams(
            dimension_semantics=("parallel", "parallel", "parallel"),
            vmem_limit_bytes=vmem_limit),
        cost_estimate=cost,
    )(x_exp, w, scale2d, shift2d)

    if Coutp != Cout:
        out = out[..., :Cout]                  # drop channel padding (only when Cout > 256)
    return jnp.transpose(out, (0, 3, 1, 2))    # NHWC -> NCHW (module contract)


def _reference(x_nchw, weight, gamma, beta, running_mean, running_var,
               *, stride=1, padding=0, dilation=1, eps=1e-5):
    y = jax.lax.conv_general_dilated(
        x_nchw, weight,
        window_strides=(stride, stride),
        padding=((padding, padding), (padding, padding)),
        rhs_dilation=(dilation, dilation),
        dimension_numbers=("NCHW", "OIHW", "NCHW"))
    scale = (gamma / jnp.sqrt(running_var + eps)).reshape(1, -1, 1, 1)
    shift = (beta - running_mean * gamma / jnp.sqrt(running_var + eps)).reshape(1, -1, 1, 1)
    return jnp.maximum(y * scale + shift, 0.0)


if __name__ == "__main__":
    key = jax.random.PRNGKey(0)
    k1, k2, k3, k4, k5, k6 = jax.random.split(key, 6)

    # Shapes consistent with BasicConv2dReLu(in_planes=4, out_planes=8,
    # kernel_size=3, stride=1, padding=1)
    N, Cin, H, W = 2, 4, 16, 16
    Cout, KH, KW = 8, 3, 3
    stride, padding, dilation = 1, 1, 1

    x = jax.random.normal(k1, (N, Cin, H, W), dtype=jnp.float32)
    weight = jax.random.normal(k2, (Cout, Cin, KH, KW), dtype=jnp.float32) * 0.1
    gamma = jax.random.normal(k3, (Cout,), dtype=jnp.float32) * 0.1 + 1.0
    beta = jax.random.normal(k4, (Cout,), dtype=jnp.float32) * 0.1
    running_mean = jax.random.normal(k5, (Cout,), dtype=jnp.float32) * 0.05
    running_var = jnp.abs(jax.random.normal(k6, (Cout,), dtype=jnp.float32)) * 0.5 + 0.5

    fwd = jax.jit(functools.partial(basic_conv2d_relu, stride=stride,
                                    padding=padding, dilation=dilation))
    out = jax.block_until_ready(fwd(x, weight, gamma, beta, running_mean, running_var))

    ref = _reference(x, weight, gamma, beta, running_mean, running_var,
                     stride=stride, padding=padding, dilation=dilation)
    assert out.shape == (N, Cout, H, W), out.shape
    # bf16 operands (f32 accumulation) -> loosened tolerance vs the f32 reference.
    assert jnp.allclose(out, ref, atol=3e-2, rtol=3e-2), "mismatch vs reference"

    print("KERNEL_OK")
</pallas_src>

<mosaic_0001>
module attributes {stable_mosaic.version = 11 : i64} {
  func.func @_conv_bn_relu_kernel(%arg0: i32, %arg1: i32, %arg2: i32, %arg3: memref<2x18x16x12xbf16, #tpu.memory_space<vmem>>, %arg4: memref<3x12x8xbf16, #tpu.memory_space<vmem>>, %arg5: memref<1x8xf32, #tpu.memory_space<vmem>>, %arg6: memref<1x8xf32, #tpu.memory_space<vmem>>, %arg7: memref<2x16x16x8xf32, #tpu.memory_space<vmem>>) attributes {dimension_semantics = [#tpu.dimension_semantics<parallel>, #tpu.dimension_semantics<parallel>, #tpu.dimension_semantics<parallel>], iteration_bounds = array<i64: 1, 1, 1>, scalar_prefetch = 0 : i64, scratch_operands = 0 : i64, tpu.core_type = #tpu.core_type<tc>, window_params = [{transform_indices = @transform_0, window_bounds = array<i64: 2, 18, 16, 12>}, {transform_indices = @transform_1, window_bounds = array<i64: 3, 12, 8>}, {transform_indices = @transform_2, window_bounds = array<i64: 1, 8>}, {transform_indices = @transform_3, window_bounds = array<i64: 1, 8>}, {transform_indices = @transform_4, window_bounds = array<i64: 2, 16, 16, 8>}]} {
    %c16_i32 = arith.constant 16 : i32
    %0 = arith.muli %arg2, %c16_i32 : i32
    %cst = arith.constant 0.000000e+00 : f32
    %1 = vector.broadcast %cst : f32 to vector<512x8xf32>
    %c0_i32 = arith.constant 0 : i32
    %2 = arith.addi %0, %c0_i32 : i32
    %c0 = arith.constant 0 : index
    %3 = arith.index_cast %2 : i32 to index
    %c0_0 = arith.constant 0 : index
    %c0_1 = arith.constant 0 : index
    %4 = vector.load %arg3[%c0, %3, %c0_0, %c0_1] : memref<2x18x16x12xbf16, #tpu.memory_space<vmem>>, vector<2x16x16x12xbf16>
    %5 = vector.shape_cast %4 : vector<2x16x16x12xbf16> to vector<512x12xbf16>
    %c0_2 = arith.constant 0 : index
    %c0_3 = arith.constant 0 : index
    %c0_4 = arith.constant 0 : index
    %6 = vector.load %arg4[%c0_2, %c0_3, %c0_4] : memref<3x12x8xbf16, #tpu.memory_space<vmem>>, vector<1x12x8xbf16>
    %7 = vector.shape_cast %6 : vector<1x12x8xbf16> to vector<12x8xbf16>
    %cst_5 = arith.constant dense<0.000000e+00> : vector<512x8xf32>
    %8 = tpu.matmul %5, %7, %cst_5 {dimension_numbers = #tpu.dot_dimension_numbers<[1], [0], [0], [1], [0, 0, 1, 1], [], []>} : vector<512x12xbf16>, vector<12x8xbf16>, vector<512x8xf32> -> vector<512x8xf32>
    %9 = arith.addf %1, %8 : vector<512x8xf32>
    %c1_i32 = arith.constant 1 : i32
    %10 = arith.addi %0, %c1_i32 : i32
    %c0_6 = arith.constant 0 : index
    %11 = arith.index_cast %10 : i32 to index
    %c0_7 = arith.constant 0 : index
    %c0_8 = arith.constant 0 : index
    %12 = vector.load %arg3[%c0_6, %11, %c0_7, %c0_8] : memref<2x18x16x12xbf16, #tpu.memory_space<vmem>>, vector<2x16x16x12xbf16>
    %13 = vector.shape_cast %12 : vector<2x16x16x12xbf16> to vector<512x12xbf16>
    %c1 = arith.constant 1 : index
    %c0_9 = arith.constant 0 : index
    %c0_10 = arith.constant 0 : index
    %14 = vector.load %arg4[%c1, %c0_9, %c0_10] : memref<3x12x8xbf16, #tpu.memory_space<vmem>>, vector<1x12x8xbf16>
    %15 = vector.shape_cast %14 : vector<1x12x8xbf16> to vector<12x8xbf16>
    %cst_11 = arith.constant dense<0.000000e+00> : vector<512x8xf32>
    %16 = tpu.matmul %13, %15, %cst_11 {dimension_numbers = #tpu.dot_dimension_numbers<[1], [0], [0], [1], [0, 0, 1, 1], [], []>} : vector<512x12xbf16>, vector<12x8xbf16>, vector<512x8xf32> -> vector<512x8xf32>
    %17 = arith.addf %9, %16 : vector<512x8xf32>
    %c2_i32 = arith.constant 2 : i32
    %18 = arith.addi %0, %c2_i32 : i32
    %c0_12 = arith.constant 0 : index
    %19 = arith.index_cast %18 : i32 to index
    %c0_13 = arith.constant 0 : index
    %c0_14 = arith.constant 0 : index
    %20 = vector.load %arg3[%c0_12, %19, %c0_13, %c0_14] : memref<2x18x16x12xbf16, #tpu.memory_space<vmem>>, vector<2x16x16x12xbf16>
    %21 = vector.shape_cast %20 : vector<2x16x16x12xbf16> to vector<512x12xbf16>
    %c2 = arith.constant 2 : index
    %c0_15 = arith.constant 0 : index
    %c0_16 = arith.constant 0 : index
    %22 = vector.load %arg4[%c2, %c0_15, %c0_16] : memref<3x12x8xbf16, #tpu.memory_space<vmem>>, vector<1x12x8xbf16>
    %23 = vector.shape_cast %22 : vector<1x12x8xbf16> to vector<12x8xbf16>
    %cst_17 = arith.constant dense<0.000000e+00> : vector<512x8xf32>
    %24 = tpu.matmul %21, %23, %cst_17 {dimension_numbers = #tpu.dot_dimension_numbers<[1], [0], [0], [1], [0, 0, 1, 1], [], []>} : vector<512x12xbf16>, vector<12x8xbf16>, vector<512x8xf32> -> vector<512x8xf32>
    %25 = arith.addf %17, %24 : vector<512x8xf32>
    %c0_18 = arith.constant 0 : index
    %c0_19 = arith.constant 0 : index
    %26 = vector.load %arg5[%c0_18, %c0_19] : memref<1x8xf32, #tpu.memory_space<vmem>>, vector<1x8xf32>
    %27 = vector.broadcast %26 : vector<1x8xf32> to vector<512x8xf32>
    %28 = arith.mulf %25, %27 : vector<512x8xf32>
    %c0_20 = arith.constant 0 : index
    %c0_21 = arith.constant 0 : index
    %29 = vector.load %arg6[%c0_20, %c0_21] : memref<1x8xf32, #tpu.memory_space<vmem>>, vector<1x8xf32>
    %30 = vector.broadcast %29 : vector<1x8xf32> to vector<512x8xf32>
    %31 = arith.addf %28, %30 : vector<512x8xf32>
    %cst_22 = arith.constant 0.000000e+00 : f32
    %32 = vector.broadcast %cst_22 : f32 to vector<512x8xf32>
    %33 = arith.maximumf %31, %32 : vector<512x8xf32>
    %34 = vector.shape_cast %33 : vector<512x8xf32> to vector<2x16x16x8xf32>
    %c0_23 = arith.constant 0 : index
    %c0_24 = arith.constant 0 : index
    %c0_25 = arith.constant 0 : index
    %c0_26 = arith.constant 0 : index
    %35 = vector.load %arg7[%c0_23, %c0_24, %c0_25, %c0_26] : memref<2x16x16x8xf32, #tpu.memory_space<vmem>>, vector<2x16x16x8xf32>
    tpu.vector_store %arg7[%c0_23, %c0_24, %c0_25, %c0_26], %34 {strides = array<i32>} : memref<2x16x16x8xf32, #tpu.memory_space<vmem>>, vector<2x16x16x8xf32>,
    return
  }
  func.func @transform_0(%arg0: i32, %arg1: i32, %arg2: i32) -> (i32, i32, i32, i32) {
    %c0_i32 = arith.constant 0 : i32
    %c0_i32_0 = arith.constant 0 : i32
    %c0_i32_1 = arith.constant 0 : i32
    %c0_i32_2 = arith.constant 0 : i32
    return %arg0, %c0_i32, %c0_i32_0, %c0_i32_1 : i32, i32, i32, i32
  }
  func.func @transform_1(%arg0: i32, %arg1: i32, %arg2: i32) -> (i32, i32, i32) {
    %c0_i32 = arith.constant 0 : i32
    %c0_i32_0 = arith.constant 0 : i32
    %c0_i32_1 = arith.constant 0 : i32
    return %c0_i32, %c0_i32_0, %arg1 : i32, i32, i32
  }
  func.func @transform_2(%arg0: i32, %arg1: i32, %arg2: i32) -> (i32, i32) {
    %c0_i32 = arith.constant 0 : i32
    %c0_i32_0 = arith.constant 0 : i32
    return %c0_i32, %arg1 : i32, i32
  }
  func.func @transform_3(%arg0: i32, %arg1: i32, %arg2: i32) -> (i32, i32) {
    %c0_i32 = arith.constant 0 : i32
    %c0_i32_0 = arith.constant 0 : i32
    return %c0_i32, %arg1 : i32, i32
  }
  func.func @transform_4(%arg0: i32, %arg1: i32, %arg2: i32) -> (i32, i32, i32, i32) {
    %c0_i32 = arith.constant 0 : i32
    %c0_i32_0 = arith.constant 0 : i32
    return %arg0, %arg2, %c0_i32, %arg1 : i32, i32, i32, i32
  }
}

</mosaic_0001>

<bundles_post_ra>
// kernel: basic_conv2d_relu.1
= control target key start
LH: loop header
LB: loop body
LE: loop exit
PB: predicated region body
PF: predicated region fallthrough
CT: control target
= control target key end

     0   :  { %vm421_vm0 = vcmask 1045504   ;;  %vm324_vm1 = vcmask 97280   ;;  %vm1795_vm2 = vcmask 64512   ;;  %s3526_s1 = inlined_call_operand.vmem [shape: bf16[3,12,8], index: 1, kind: input, shape index: {}]   ;;  %s3527_s0 = inlined_call_operand.vmem [shape: bf16[2,18,16,12], index: 0, kind: input, shape index: {}]   ;;  %s3528_s2 = inlined_call_operand.vmem [shape: f32[1,8], index: 2, kind: input, shape index: {}]   ;;  %s3529_s3 = inlined_call_operand.vmem [shape: f32[1,8], index: 3, kind: input, shape index: {}]   ;;  %s3530_s4 = inlined_call_operand.vmem [shape: f32[2,16,16,8], index: 4, kind: output, shape index: {}]  }
   0x1   :  { %v2062_v0 = vld [vmem:[%s3526_s1 + $0x8] sm:$0xf]  ;;  %v2555_v1 = vld [vmem:[%s3526_s1 + $0x8] sm:$0x30]  ;;  %v2226_v2 = vld [vmem:[%s3526_s1] sm:$0xf] }
   0x2   :  { %v2063_v3 = vor.u32 %v2555_v1, %v2062_v0  ;;  %v2522_v4 = vld [vmem:[%s3526_s1] sm:$0x30]  ;;  %v2456_v5 = vld [vmem:[%s3526_s1 + $0x10] sm:$0xf]  ;;  %v2588_v6 = vld [vmem:[%s3526_s1 + $0x10] sm:$0x30] }
   0x3   :  { %v2227_v7 = vor.u32 %v2522_v4, %v2226_v2  ;;  %v2457_v8 = vor.u32 %v2588_v6, %v2456_v5  ;;  %v2523_v10 = vld [vmem:[%s3527_s0 + $0x8] sm:$0xff]  ;;  %v2547_v11 = vld [vmem:[%s3527_s0 + $0xd8] sm:$0xff]  ;;  %v2490_v14 = vld [vmem:[%s3527_s0] sm:$0xff] }
   0x4   :  { %v423_v9 = vsel %vm421_vm0, %v2063_v3, 0  ;;  %v2556_v15 = vld [vmem:[%s3527_s0 + $0x10] sm:$0xff]  ;;  %v2548_v17 = vld [vmem:[%s3527_s0 + $0xe0] sm:$0xff]  ;;  %v2491_v18 = vld [vmem:[%s3527_s0 + $0x8] sm:$0xff] }
   0x5   :  { %432 = vmatpush.bf16.msra.mxu0 %v423_v9  ;;  %2589 = vmatpush.bf16.msra.mxu3 %v423_v9  ;;  %v856_v12 = vsel %vm421_vm0, %v2227_v7, 0  ;;  %v1360_v13 = vsel %vm421_vm0, %v2457_v8, 0  ;;  %v2524_v16 = vld [vmem:[%s3527_s0 + $0x10] sm:$0xff]  ;;  %v2557_v19 = vld [vmem:[%s3527_s0 + $0x18] sm:$0xff]  ;;  %v2549_v21 = vld [vmem:[%s3527_s0 + $0xe8] sm:$0xff] }
   0x6   :  { %865 = vmatpush.bf16.msra.mxu1 %v856_v12  ;;  %1369 = vmatpush.bf16.msra.mxu2 %v1360_v13  ;;  %v2525_v20 = vld [vmem:[%s3527_s0 + $0x18] sm:$0xff]  ;;  %v2492_v22 = vld [vmem:[%s3527_s0 + $0x10] sm:$0xff]  ;;  %v2558_v23 = vld [vmem:[%s3527_s0 + $0x20] sm:$0xff] }
   0x7   :  { %v2526_v24 = vld [vmem:[%s3527_s0 + $0x20] sm:$0xff]  ;;  %v2550_v25 = vld [vmem:[%s3527_s0 + $0xf0] sm:$0xff]  ;;  %v2493_v26 = vld [vmem:[%s3527_s0 + $0x18] sm:$0xff] }
   0x8   :  { %2064 = vmatmul.msk.bf16.vlgmr.msra.gmra.mxu0 %vm324_vm1, %v2523_v10  ;;  %2088 = vmatmul.msk.bf16.vlgmr.msra.gmra.mxu3 %vm324_vm1, %v2547_v11  ;;  %v2559_v27 = vld [vmem:[%s3527_s0 + $0x28] sm:$0xff]  ;;  %v2551_v29 = vld [vmem:[%s3527_s0 + $0xf8] sm:$0xff]  ;;  %v2494_v30 = vld [vmem:[%s3527_s0 + $0x20] sm:$0xff] }
   0x9   :  { %2590 = vmatpush.bf16.msrb.mxu3 %v856_v12  ;;  %2228 = vmatmul.msk.bf16.vlgmr.msra.gmra.mxu1 %vm324_vm1, %v2490_v14  ;;  %v2527_v28 = vld [vmem:[%s3527_s0 + $0x28] sm:$0xff]  ;;  %v2560_v31 = vld [vmem:[%s3527_s0 + $0x30] sm:$0xff]  ;;  %v2552_v33 = vld [vmem:[%s3527_s0 + $0x100] sm:$0xff] }
   0xa   :  { %2458 = vmatmul.msk.bf16.vlgmr.msra.gmra.mxu2 %vm324_vm1, %v2556_v15  ;;  %v2528_v32 = vld [vmem:[%s3527_s0 + $0x30] sm:$0xff]  ;;  %v2495_v34 = vld [vmem:[%s3527_s0 + $0x28] sm:$0xff]  ;;  %v2561_v35 = vld [vmem:[%s3527_s0 + $0x38] sm:$0xff] }
   0xb   :  { %v2529_v36 = vld [vmem:[%s3527_s0 + $0x38] sm:$0xff]  ;;  %v2553_v37 = vld [vmem:[%s3527_s0 + $0x108] sm:$0xff]  ;;  %v2496_v38 = vld [vmem:[%s3527_s0 + $0x30] sm:$0xff] }
   0xc   :  { %v2562_v39 = vld [vmem:[%s3527_s0 + $0x40] sm:$0xff]  ;;  %v2554_v41 = vld [vmem:[%s3527_s0 + $0x110] sm:$0xff]  ;;  %v2497_v42 = vld [vmem:[%s3527_s0 + $0x38] sm:$0xff] }
   0xd   :  { %2591 = vmatpush.bf16.msra.mxu3 %v1360_v13  ;;  %v2530_v40 = vld [vmem:[%s3527_s0 + $0x40] sm:$0xff]  ;;  %v2563_v43 = vld [vmem:[%s3527_s0 + $0x48] sm:$0xff]  ;;  %v2514_v45 = vld [vmem:[%s3527_s0 + $0xd0] sm:$0xff] }
   0xe   :  { %v2531_v44 = vld [vmem:[%s3527_s0 + $0x48] sm:$0xff]  ;;  %v2498_v47 = vld [vmem:[%s3527_s0 + $0x40] sm:$0xff]  ;;  %v2564_v48 = vld [vmem:[%s3527_s0 + $0x50] sm:$0xff] }
   0xf   :  { %v2791_v52 = vld [vmem:[%s3528_s2] ss:$0 sm:$0xff]  ;;  %v2532_v0 = vld [vmem:[%s3527_s0 + $0x50] sm:$0xff]  ;;  %v2515_v1 = vld [vmem:[%s3527_s0 + $0xd8] sm:$0xff] }
  0x10   :  { %v2796_v55 = vld [vmem:[%s3529_s3] ss:$0 sm:$0xff]  ;;  %v2499_v4 = vld [vmem:[%s3527_s0 + $0x48] sm:$0xff]  ;;  %v2565_v5 = vld [vmem:[%s3527_s0 + $0x58] sm:$0xff] }
  0x18   :  { %2065 = vmatmul.msk.bf16.gmra.mxu0 %vm324_vm1, %v2524_v16  ;;  %2089 = vmatmul.msk.bf16.gmra.mxu3 %vm324_vm1, %v2548_v17 }
  0x19   :  { %2229 = vmatmul.msk.bf16.gmra.mxu1 %vm324_vm1, %v2491_v18 }
  0x1a   :  { %2459 = vmatmul.msk.bf16.gmra.mxu2 %vm324_vm1, %v2557_v19 }
  0x28   :  { %2066 = vmatmul.msk.bf16.gmra.mxu0 %vm324_vm1, %v2525_v20  ;;  %2090 = vmatmul.msk.bf16.gmra.mxu3 %vm324_vm1, %v2549_v21 }
  0x29   :  { %2230 = vmatmul.msk.bf16.gmra.mxu1 %vm324_vm1, %v2492_v22  ;;  %v2533_v22 = vld [vmem:[%s3527_s0 + $0x58] sm:$0xff] }
  0x2a   :  { %2460 = vmatmul.msk.bf16.gmra.mxu2 %vm324_vm1, %v2558_v23  ;;  %v2516_v23 = vld [vmem:[%s3527_s0 + $0xe0] sm:$0xff] }
  0x38   :  { %2067 = vmatmul.msk.bf16.gmra.mxu0 %vm324_vm1, %v2526_v24  ;;  %2091 = vmatmul.msk.bf16.gmra.mxu3 %vm324_vm1, %v2550_v25 }
  0x39   :  { %2231 = vmatmul.msk.bf16.gmra.mxu1 %vm324_vm1, %v2493_v26  ;;  %v2500_v26 = vld [vmem:[%s3527_s0 + $0x50] sm:$0xff] }
  0x3a   :  { %2461 = vmatmul.msk.bf16.gmra.mxu2 %vm324_vm1, %v2559_v27  ;;  %v2566_v27 = vld [vmem:[%s3527_s0 + $0x60] sm:$0xff] }
  0x48   :  { %2068 = vmatmul.msk.bf16.gmra.mxu0 %vm324_vm1, %v2527_v28  ;;  %2092 = vmatmul.msk.bf16.gmra.mxu3 %vm324_vm1, %v2551_v29 }
  0x49   :  { %2232 = vmatmul.msk.bf16.gmra.mxu1 %vm324_vm1, %v2494_v30 }
  0x4a   :  { %2462 = vmatmul.msk.bf16.gmra.mxu2 %vm324_vm1, %v2560_v31 }
  0x58   :  { %2069 = vmatmul.msk.bf16.gmra.mxu0 %vm324_vm1, %v2528_v32  ;;  %2093 = vmatmul.msk.bf16.gmra.mxu3 %vm324_vm1, %v2552_v33 }
  0x59   :  { %2233 = vmatmul.msk.bf16.gmra.mxu1 %vm324_vm1, %v2495_v34 }
  0x5a   :  { %2463 = vmatmul.msk.bf16.gmra.mxu2 %vm324_vm1, %v2561_v35 }
  0x68   :  { %2070 = vmatmul.msk.bf16.gmra.mxu0 %vm324_vm1, %v2529_v36  ;;  %2094 = vmatmul.msk.bf16.gmra.mxu3 %vm324_vm1, %v2553_v37 }
  0x69   :  { %2234 = vmatmul.msk.bf16.gmra.mxu1 %vm324_vm1, %v2496_v38 }
  0x6a   :  { %2464 = vmatmul.msk.bf16.gmra.mxu2 %vm324_vm1, %v2562_v39 }
  0x78   :  { %2071 = vmatmul.msk.bf16.gmra.mxu0 %vm324_vm1, %v2530_v40  ;;  %2095 = vmatmul.msk.bf16.gmra.mxu3 %vm324_vm1, %v2554_v41 }
  0x79   :  { %2235 = vmatmul.msk.bf16.gmra.mxu1 %vm324_vm1, %v2497_v42 }
  0x7a   :  { %2465 = vmatmul.msk.bf16.gmra.mxu2 %vm324_vm1, %v2563_v43 }
  0x85   :  { %v434_v46 = vpop.f32.mrf.mxu0 }
  0x86   :  { %v867_v49 = vpop.f32.mrf.mxu1 }
  0x87   :  { %v868_v50 = vadd.f32 %v867_v49, %v434_v46  ;;  %v2567_v49 = vld [vmem:[%s3527_s0 + $0x68] sm:$0xff] }
  0x88   :  { %2072 = vmatmul.msk.bf16.gmra.mxu0 %vm324_vm1, %v2531_v44  ;;  %2252 = vmatmul.msk.bf16.vlgmr.msrb.gmra.mxu3 %vm324_vm1, %v2514_v45  ;;  %v2534_v44 = vld [vmem:[%s3527_s0 + $0x60] sm:$0xff]  ;;  %v2517_v45 = vld [vmem:[%s3527_s0 + $0xe8] sm:$0xff] }
  0x89   :  { %2236 = vmatmul.msk.bf16.gmra.mxu1 %vm324_vm1, %v2498_v47 }
  0x8a   :  { %2466 = vmatmul.msk.bf16.gmra.mxu2 %vm324_vm1, %v2564_v48  ;;  %v2501_v48 = vld [vmem:[%s3527_s0 + $0x58] sm:$0xff] }
  0x8b   :  { %v2786_v51 = vpop.f32.mrf.mxu3 }
  0x8d   :  { %v1371_v53 = vpop.f32.mrf.mxu2  ;;  %v436_v56 = vpop.f32.mrf.mxu0 }
  0x8e   :  { %v1531_v54 = vadd.f32 %v1371_v53, %v868_v50  ;;  %v869_v57 = vpop.f32.mrf.mxu1 }
  0x8f   :  { %v870_v61 = vadd.f32 %v869_v57, %v436_v56 }
  0x90   :  { %v1599_v58 = vmul.f32 %v2791_v52, %v1531_v54 }
  0x92   :  { %v1667_v59 = vadd.f32 %v2796_v55, %v1599_v58 }
  0x93   :  { %v2800_v62 = vpop.f32.mrf.mxu3 }
  0x94   :  { %v1731_v60 = vmax.f32 %v1667_v59, 0.0 }
  0x95   :  { %v1373_v63 = vpop.f32.mrf.mxu2  ;;  %v439_v3 = vpop.f32.mrf.mxu0 }
  0x96   :  { %1796 = vst.msk [vmem:[%s3530_s4] sm:$0xff] %vm1795_vm2, %v1731_v60  ;;  %v1532_v2 = vadd.f32 %v1373_v63, %v870_v61  ;;  %v872_v6 = vpop.f32.mrf.mxu1 }
  0x97   :  { %v873_v9 = vadd.f32 %v872_v6, %v439_v3  ;;  %v2535_v6 = vld [vmem:[%s3527_s0 + $0x68] sm:$0xff] }
  0x98   :  { %v1600_v7 = vmul.f32 %v2791_v52, %v1532_v2  ;;  %2073 = vmatmul.msk.bf16.gmra.mxu0 %vm324_vm1, %v2532_v0  ;;  %2253 = vmatmul.msk.bf16.gmra.mxu3 %vm324_vm1, %v2515_v1 }
  0x99   :  { %2237 = vmatmul.msk.bf16.gmra.mxu1 %vm324_vm1, %v2499_v4 }
  0x9a   :  { %v1668_v8 = vadd.f32 %v2796_v55, %v1600_v7  ;;  %2467 = vmatmul.msk.bf16.gmra.mxu2 %vm324_vm1, %v2565_v5  ;;  %v2518_v7 = vld [vmem:[%s3527_s0 + $0xf0] sm:$0xff] }
  0x9b   :  { %v2824_v11 = vpop.f32.mrf.mxu3 }
  0x9c   :  { %v1732_v10 = vmax.f32 %v1668_v8, 0.0 }
  0x9d   :  { %v1376_v12 = vpop.f32.mrf.mxu2  ;;  %v441_v14 = vpop.f32.mrf.mxu0 }
  0x9e   :  { %1797 = vst.msk [vmem:[%s3530_s4 + $0x8] sm:$0xff] %vm1795_vm2, %v1732_v10  ;;  %v1533_v13 = vadd.f32 %v1376_v12, %v873_v9  ;;  %v874_v15 = vpop.f32.mrf.mxu1  ;;  %v2502_v10 = vld [vmem:[%s3527_s0 + $0x60] sm:$0xff]  ;;  %v2568_v12 = vld [vmem:[%s3527_s0 + $0x70] sm:$0xff] }
  0x9f   :  { %v875_v19 = vadd.f32 %v874_v15, %v441_v14 }
  0xa0   :  { %v1601_v16 = vmul.f32 %v2791_v52, %v1533_v13 }
  0xa2   :  { %v1669_v17 = vadd.f32 %v2796_v55, %v1601_v16 }
  0xa3   :  { %v2832_v20 = vpop.f32.mrf.mxu3 }
  0xa4   :  { %v1733_v18 = vmax.f32 %v1669_v17, 0.0 }
  0xa5   :  { %v1378_v21 = vpop.f32.mrf.mxu2  ;;  %v444_v25 = vpop.f32.mrf.mxu0 }
  0xa6   :  { %1798 = vst.msk [vmem:[%s3530_s4 + $0x10] sm:$0xff] %vm1795_vm2, %v1733_v18  ;;  %v1534_v24 = vadd.f32 %v1378_v21, %v875_v19  ;;  %v877_v28 = vpop.f32.mrf.mxu1 }
  0xa7   :  { %v878_v31 = vadd.f32 %v877_v28, %v444_v25 }
  0xa8   :  { %v1602_v29 = vmul.f32 %v2791_v52, %v1534_v24  ;;  %2074 = vmatmul.msk.bf16.gmra.mxu0 %vm324_vm1, %v2533_v22  ;;  %2254 = vmatmul.msk.bf16.gmra.mxu3 %vm324_vm1, %v2516_v23 }
  0xa9   :  { %2238 = vmatmul.msk.bf16.gmra.mxu1 %vm324_vm1, %v2500_v26 }
  0xaa   :  { %v1670_v30 = vadd.f32 %v2796_v55, %v1602_v29  ;;  %2468 = vmatmul.msk.bf16.gmra.mxu2 %vm324_vm1, %v2566_v27 }
  0xab   :  { %v2856_v33 = vpop.f32.mrf.mxu3 }
  0xac   :  { %v1734_v32 = vmax.f32 %v1670_v30, 0.0  ;;  %v2536_v30 = vld [vmem:[%s3527_s0 + $0x70] sm:$0xff] }
  0xad   :  { %v1381_v34 = vpop.f32.mrf.mxu2  ;;  %v446_v36 = vpop.f32.mrf.mxu0 }
  0xae   :  { %1799 = vst.msk [vmem:[%s3530_s4 + $0x18] sm:$0xff] %vm1795_vm2, %v1734_v32  ;;  %v1535_v35 = vadd.f32 %v1381_v34, %v878_v31  ;;  %v879_v37 = vpop.f32.mrf.mxu1  ;;  %v2519_v31 = vld [vmem:[%s3527_s0 + $0xf8] sm:$0xff] }
  0xaf   :  { %v880_v41 = vadd.f32 %v879_v37, %v446_v36  ;;  %v2569_v36 = vld [vmem:[%s3527_s0 + $0x78] sm:$0xff] }
  0xb0   :  { %v1603_v38 = vmul.f32 %v2791_v52, %v1535_v35  ;;  %v2503_v35 = vld [vmem:[%s3527_s0 + $0x68] sm:$0xff] }
  0xb2   :  { %v1671_v39 = vadd.f32 %v2796_v55, %v1603_v38 }
  0xb3   :  { %v2864_v42 = vpop.f32.mrf.mxu3 }
  0xb4   :  { %v1735_v40 = vmax.f32 %v1671_v39, 0.0 }
  0xb5   :  { %v1383_v43 = vpop.f32.mrf.mxu2  ;;  %v449_v47 = vpop.f32.mrf.mxu0 }
  0xb6   :  { %1800 = vst.msk [vmem:[%s3530_s4 + $0x20] sm:$0xff] %vm1795_vm2, %v1735_v40  ;;  %v1536_v46 = vadd.f32 %v1383_v43, %v880_v41  ;;  %v882_v50 = vpop.f32.mrf.mxu1 }
  0xb7   :  { %v883_v56 = vadd.f32 %v882_v50, %v449_v47 }
  0xb8   :  { %v1604_v53 = vmul.f32 %v2791_v52, %v1536_v46  ;;  %2075 = vmatmul.msk.bf16.gmra.mxu0 %vm324_vm1, %v2534_v44  ;;  %2255 = vmatmul.msk.bf16.gmra.mxu3 %vm324_vm1, %v2517_v45 }
  0xb9   :  { %2239 = vmatmul.msk.bf16.gmra.mxu1 %vm324_vm1, %v2501_v48 }
  0xba   :  { %v1672_v54 = vadd.f32 %v2796_v55, %v1604_v53  ;;  %2469 = vmatmul.msk.bf16.gmra.mxu2 %vm324_vm1, %v2567_v49 }
  0xbb   :  { %v2888_v58 = vpop.f32.mrf.mxu3 }
  0xbc   :  { %v1736_v57 = vmax.f32 %v1672_v54, 0.0 }
  0xbd   :  { %v1386_v59 = vpop.f32.mrf.mxu2  ;;  %v451_v61 = vpop.f32.mrf.mxu0 }
  0xbe   :  { %1801 = vst.msk [vmem:[%s3530_s4 + $0x28] sm:$0xff] %vm1795_vm2, %v1736_v57  ;;  %v1537_v60 = vadd.f32 %v1386_v59, %v883_v56  ;;  %v884_v63 = vpop.f32.mrf.mxu1  ;;  %v2537_v57 = vld [vmem:[%s3527_s0 + $0x78] sm:$0xff]  ;;  %v2520_v59 = vld [vmem:[%s3527_s0 + $0x100] sm:$0xff] }
  0xbf   :  { %v885_v3 = vadd.f32 %v884_v63, %v451_v61  ;;  %v2504_v63 = vld [vmem:[%s3527_s0 + $0x70] sm:$0xff] }
  0xc0   :  { %v1605_v0 = vmul.f32 %v2791_v52, %v1537_v60 }
  0xc2   :  { %v1673_v1 = vadd.f32 %v2796_v55, %v1605_v0  ;;  %v2570_v0 = vld [vmem:[%s3527_s0 + $0x80] sm:$0xff] }
  0xc3   :  { %v2896_v4 = vpop.f32.mrf.mxu3 }
  0xc4   :  { %v1737_v2 = vmax.f32 %v1673_v1, 0.0 }
  0xc5   :  { %v1388_v5 = vpop.f32.mrf.mxu2  ;;  %v454_v9 = vpop.f32.mrf.mxu0 }
  0xc6   :  { %1802 = vst.msk [vmem:[%s3530_s4 + $0x30] sm:$0xff] %vm1795_vm2, %v1737_v2  ;;  %v1538_v8 = vadd.f32 %v1388_v5, %v885_v3  ;;  %v887_v13 = vpop.f32.mrf.mxu1 }
  0xc7   :  { %v888_v16 = vadd.f32 %v887_v13, %v454_v9 }
  0xc8   :  { %v1606_v14 = vmul.f32 %v2791_v52, %v1538_v8  ;;  %2076 = vmatmul.msk.bf16.gmra.mxu0 %vm324_vm1, %v2535_v6  ;;  %2256 = vmatmul.msk.bf16.gmra.mxu3 %vm324_vm1, %v2518_v7 }
  0xc9   :  { %2240 = vmatmul.msk.bf16.gmra.mxu1 %vm324_vm1, %v2502_v10 }
  0xca   :  { %v1674_v15 = vadd.f32 %v2796_v55, %v1606_v14  ;;  %2470 = vmatmul.msk.bf16.gmra.mxu2 %vm324_vm1, %v2568_v12 }
  0xcb   :  { %v2920_v18 = vpop.f32.mrf.mxu3 }
  0xcc   :  { %v1738_v17 = vmax.f32 %v1674_v15, 0.0 }
  0xcd   :  { %v1391_v19 = vpop.f32.mrf.mxu2  ;;  %v456_v22 = vpop.f32.mrf.mxu0 }
  0xce   :  { %1803 = vst.msk [vmem:[%s3530_s4 + $0x38] sm:$0xff] %vm1795_vm2, %v1738_v17  ;;  %v1539_v21 = vadd.f32 %v1391_v19, %v888_v16  ;;  %v889_v23 = vpop.f32.mrf.mxu1 }
  0xcf   :  { %v890_v27 = vadd.f32 %v889_v23, %v456_v22  ;;  %v2521_v22 = vld [vmem:[%s3527_s0 + $0x108] sm:$0xff] }
  0xd0   :  { %v1607_v24 = vmul.f32 %v2791_v52, %v1539_v21  ;;  %v2538_v21 = vld [vmem:[%s3527_s0 + $0x80] sm:$0xff] }
  0xd2   :  { %v1675_v25 = vadd.f32 %v2796_v55, %v1607_v24 }
  0xd3   :  { %v2928_v28 = vpop.f32.mrf.mxu3 }
  0xd4   :  { %v1739_v26 = vmax.f32 %v1675_v25, 0.0  ;;  %v2505_v25 = vld [vmem:[%s3527_s0 + $0x78] sm:$0xff] }
  0xd5   :  { %v1393_v29 = vpop.f32.mrf.mxu2  ;;  %v459_v34 = vpop.f32.mrf.mxu0 }
  0xd6   :  { %1804 = vst.msk [vmem:[%s3530_s4 + $0x40] sm:$0xff] %vm1795_vm2, %v1739_v26  ;;  %v1540_v32 = vadd.f32 %v1393_v29, %v890_v27  ;;  %v892_v37 = vpop.f32.mrf.mxu1  ;;  %v2571_v26 = vld [vmem:[%s3527_s0 + $0x88] sm:$0xff] }
  0xd7   :  { %v893_v40 = vadd.f32 %v892_v37, %v459_v34 }
  0xd8   :  { %v1608_v38 = vmul.f32 %v2791_v52, %v1540_v32  ;;  %2077 = vmatmul.msk.bf16.gmra.mxu0 %vm324_vm1, %v2536_v30  ;;  %2257 = vmatmul.msk.bf16.gmra.mxu3 %vm324_vm1, %v2519_v31 }
  0xd9   :  { %2241 = vmatmul.msk.bf16.gmra.mxu1 %vm324_vm1, %v2503_v35 }
  0xda   :  { %v1676_v39 = vadd.f32 %v2796_v55, %v1608_v38  ;;  %2471 = vmatmul.msk.bf16.gmra.mxu2 %vm324_vm1, %v2569_v36 }
  0xdb   :  { %v2952_v43 = vpop.f32.mrf.mxu3 }
  0xdc   :  { %v1740_v41 = vmax.f32 %v1676_v39, 0.0 }
  0xdd   :  { %v1396_v44 = vpop.f32.mrf.mxu2  ;;  %v461_v46 = vpop.f32.mrf.mxu0 }
  0xde   :  { %1805 = vst.msk [vmem:[%s3530_s4 + $0x48] sm:$0xff] %vm1795_vm2, %v1740_v41  ;;  %v1541_v45 = vadd.f32 %v1396_v44, %v893_v40  ;;  %v894_v47 = vpop.f32.mrf.mxu1 }
  0xdf   :  { %v895_v53 = vadd.f32 %v894_v47, %v461_v46  ;;  %v2539_v47 = vld [vmem:[%s3527_s0 + $0x98] sm:$0xff] }
  0xe0   :  { %v1609_v48 = vmul.f32 %v2791_v52, %v1541_v45 }
  0xe2   :  { %v1677_v49 = vadd.f32 %v2796_v55, %v1609_v48  ;;  %v2580_v48 = vld [vmem:[%s3527_s0 + $0xe0] sm:$0xff] }
  0xe3   :  { %v2960_v54 = vpop.f32.mrf.mxu3 }
  0xe4   :  { %v1741_v50 = vmax.f32 %v1677_v49, 0.0 }
  0xe5   :  { %v1398_v56 = vpop.f32.mrf.mxu2  ;;  %v464_v61 = vpop.f32.mrf.mxu0 }
  0xe6   :  { %1806 = vst.msk [vmem:[%s3530_s4 + $0x50] sm:$0xff] %vm1795_vm2, %v1741_v50  ;;  %v1542_v60 = vadd.f32 %v1398_v56, %v895_v53  ;;  %v897_v1 = vpop.f32.mrf.mxu1  ;;  %v2506_v53 = vld [vmem:[%s3527_s0 + $0x90] sm:$0xff]  ;;  %v2572_v56 = vld [vmem:[%s3527_s0 + $0xa0] sm:$0xff] }
  0xe7   :  { %v898_v5 = vadd.f32 %v897_v1, %v464_v61 }
  0xe8   :  { %v1610_v2 = vmul.f32 %v2791_v52, %v1542_v60  ;;  %2078 = vmatmul.msk.bf16.gmra.mxu0 %vm324_vm1, %v2537_v57  ;;  %2258 = vmatmul.msk.bf16.gmra.mxu3 %vm324_vm1, %v2520_v59 }
  0xe9   :  { %2242 = vmatmul.msk.bf16.gmra.mxu1 %vm324_vm1, %v2504_v63 }
  0xea   :  { %v1678_v3 = vadd.f32 %v2796_v55, %v1610_v2  ;;  %2472 = vmatmul.msk.bf16.gmra.mxu2 %vm324_vm1, %v2570_v0 }
  0xeb   :  { %v2984_v7 = vpop.f32.mrf.mxu3 }
  0xec   :  { %v1742_v6 = vmax.f32 %v1678_v3, 0.0 }
  0xed   :  { %v1401_v8 = vpop.f32.mrf.mxu2  ;;  %v466_v10 = vpop.f32.mrf.mxu0 }
  0xee   :  { %1807 = vst.msk [vmem:[%s3530_s4 + $0x58] sm:$0xff] %vm1795_vm2, %v1742_v6  ;;  %v1543_v9 = vadd.f32 %v1401_v8, %v898_v5  ;;  %v899_v12 = vpop.f32.mrf.mxu1 }
  0xef   :  { %v900_v16 = vadd.f32 %v899_v12, %v466_v10 }
  0xf0   :  { %v1611_v13 = vmul.f32 %v2791_v52, %v1543_v9 }
  0xf2   :  { %v1679_v14 = vadd.f32 %v2796_v55, %v1611_v13 }
  0xf3   :  { %v2992_v17 = vpop.f32.mrf.mxu3 }
  0xf4   :  { %v1743_v15 = vmax.f32 %v1679_v14, 0.0  ;;  %v2540_v14 = vld [vmem:[%s3527_s0 + $0xa0] sm:$0xff] }
  0xf5   :  { %v1403_v19 = vpop.f32.mrf.mxu2  ;;  %v469_v24 = vpop.f32.mrf.mxu0 }
  0xf6   :  { %1808 = vst.msk [vmem:[%s3530_s4 + $0x60] sm:$0xff] %vm1795_vm2, %v1743_v15  ;;  %v1544_v23 = vadd.f32 %v1403_v19, %v900_v16  ;;  %v902_v27 = vpop.f32.mrf.mxu1  ;;  %v2581_v15 = vld [vmem:[%s3527_s0 + $0xe8] sm:$0xff] }
  0xf7   :  { %v903_v31 = vadd.f32 %v902_v27, %v469_v24 }
  0xf8   :  { %v1612_v29 = vmul.f32 %v2791_v52, %v1544_v23  ;;  %2079 = vmatmul.msk.bf16.gmra.mxu0 %vm324_vm1, %v2538_v21  ;;  %2259 = vmatmul.msk.bf16.gmra.mxu3 %vm324_vm1, %v2521_v22  ;;  %v2507_v21 = vld [vmem:[%s3527_s0 + $0x98] sm:$0xff]  ;;  %v2573_v22 = vld [vmem:[%s3527_s0 + $0xa8] sm:$0xff] }
  0xf9   :  { %2243 = vmatmul.msk.bf16.gmra.mxu1 %vm324_vm1, %v2505_v25 }
  0xfa   :  { %v1680_v30 = vadd.f32 %v2796_v55, %v1612_v29  ;;  %2473 = vmatmul.msk.bf16.gmra.mxu2 %vm324_vm1, %v2571_v26 }
  0xfb   :  { %v3016_v34 = vpop.f32.mrf.mxu3 }
  0xfc   :  { %v1744_v32 = vmax.f32 %v1680_v30, 0.0 }
  0xfd   :  { %v1406_v35 = vpop.f32.mrf.mxu2  ;;  %v471_v37 = vpop.f32.mrf.mxu0 }
  0xfe   :  { %1809 = vst.msk [vmem:[%s3530_s4 + $0x68] sm:$0xff] %vm1795_vm2, %v1744_v32  ;;  %v1545_v36 = vadd.f32 %v1406_v35, %v903_v31  ;;  %v904_v38 = vpop.f32.mrf.mxu1 }
  0xff   :  { %v905_v44 = vadd.f32 %v904_v38, %v471_v37 }
 0x100   :  { %v1613_v39 = vmul.f32 %v2791_v52, %v1545_v36 }
 0x102   :  { %v1681_v40 = vadd.f32 %v2796_v55, %v1613_v39 }
 0x103   :  { %v3024_v45 = vpop.f32.mrf.mxu3 }
 0x104   :  { %v1745_v41 = vmax.f32 %v1681_v40, 0.0 }
 0x105   :  { %v1408_v46 = vpop.f32.mrf.mxu2  ;;  %v474_v50 = vpop.f32.mrf.mxu0 }
 0x106   :  { %1810 = vst.msk [vmem:[%s3530_s4 + $0x70] sm:$0xff] %vm1795_vm2, %v1745_v41  ;;  %v1546_v49 = vadd.f32 %v1408_v46, %v905_v44  ;;  %v907_v57 = vpop.f32.mrf.mxu1  ;;  %v2541_v44 = vld [vmem:[%s3527_s0 + $0xa8] sm:$0xff]  ;;  %v2582_v46 = vld [vmem:[%s3527_s0 + $0xf0] sm:$0xff] }
 0x107   :  { %v908_v61 = vadd.f32 %v907_v57, %v474_v50  ;;  %v2574_v50 = vld [vmem:[%s3527_s0 + $0xb0] sm:$0xff] }
 0x108   :  { %v1614_v59 = vmul.f32 %v2791_v52, %v1546_v49  ;;  %2080 = vmatmul.msk.bf16.gmra.mxu0 %vm324_vm1, %v2539_v47  ;;  %2482 = vmatmul.msk.bf16.vlgmr.msra.gmra.mxu3 %vm324_vm1, %v2580_v48  ;;  %v2508_v49 = vld [vmem:[%s3527_s0 + $0xa0] sm:$0xff] }
 0x109   :  { %2244 = vmatmul.msk.bf16.gmra.mxu1 %vm324_vm1, %v2506_v53 }
 0x10a   :  { %v1682_v60 = vadd.f32 %v2796_v55, %v1614_v59  ;;  %2474 = vmatmul.msk.bf16.gmra.mxu2 %vm324_vm1, %v2572_v56 }
 0x10b   :  { %v3048_v0 = vpop.f32.mrf.mxu3 }
 0x10c   :  { %v1746_v63 = vmax.f32 %v1682_v60, 0.0 }
 0x10d   :  { %v1411_v1 = vpop.f32.mrf.mxu2  ;;  %v476_v3 = vpop.f32.mrf.mxu0 }
 0x10e   :  { %1811 = vst.msk [vmem:[%s3530_s4 + $0x78] sm:$0xff] %vm1795_vm2, %v1746_v63  ;;  %v1547_v2 = vadd.f32 %v1411_v1, %v908_v61  ;;  %v909_v5 = vpop.f32.mrf.mxu1 }
 0x10f   :  { %v910_v10 = vadd.f32 %v909_v5, %v476_v3 }
 0x110   :  { %v1615_v6 = vmul.f32 %v2791_v52, %v1547_v2 }
 0x112   :  { %v1683_v8 = vadd.f32 %v2796_v55, %v1615_v6 }
 0x113   :  { %v3056_v12 = vpop.f32.mrf.mxu3 }
 0x114   :  { %v1747_v9 = vmax.f32 %v1683_v8, 0.0 }
 0x115   :  { %v1413_v13 = vpop.f32.mrf.mxu2  ;;  %v479_v19 = vpop.f32.mrf.mxu0 }
 0x116   :  { %1812 = vst.msk [vmem:[%s3530_s4 + $0x80] sm:$0xff] %vm1795_vm2, %v1747_v9  ;;  %v1548_v16 = vadd.f32 %v1413_v13, %v910_v10  ;;  %v912_v23 = vpop.f32.mrf.mxu1 }
 0x117   :  { %v913_v26 = vadd.f32 %v912_v23, %v479_v19 }
 0x118   :  { %v1616_v24 = vmul.f32 %v2791_v52, %v1548_v16  ;;  %2081 = vmatmul.msk.bf16.gmra.mxu0 %vm324_vm1, %v2540_v14  ;;  %2483 = vmatmul.msk.bf16.gmra.mxu3 %vm324_vm1, %v2581_v15  ;;  %v2542_v14 = vld [vmem:[%s3527_s0 + $0xb0] sm:$0xff]  ;;  %v2583_v15 = vld [vmem:[%s3527_s0 + $0xf8] sm:$0xff] }
 0x119   :  { %2245 = vmatmul.msk.bf16.gmra.mxu1 %vm324_vm1, %v2507_v21  ;;  %v2509_v21 = vld [vmem:[%s3527_s0 + $0xa8] sm:$0xff] }
 0x11a   :  { %v1684_v25 = vadd.f32 %v2796_v55, %v1616_v24  ;;  %2475 = vmatmul.msk.bf16.gmra.mxu2 %vm324_vm1, %v2573_v22  ;;  %v2575_v22 = vld [vmem:[%s3527_s0 + $0xb8] sm:$0xff] }
 0x11b   :  { %v3080_v29 = vpop.f32.mrf.mxu3 }
 0x11c   :  { %v1748_v27 = vmax.f32 %v1684_v25, 0.0 }
 0x11d   :  { %v1416_v30 = vpop.f32.mrf.mxu2  ;;  %v481_v32 = vpop.f32.mrf.mxu0 }
 0x11e   :  { %1813 = vst.msk [vmem:[%s3530_s4 + $0x88] sm:$0xff] %vm1795_vm2, %v1748_v27  ;;  %v1549_v31 = vadd.f32 %v1416_v30, %v913_v26  ;;  %v914_v35 = vpop.f32.mrf.mxu1 }
 0x11f   :  { %v915_v39 = vadd.f32 %v914_v35, %v481_v32 }
 0x120   :  { %v1617_v36 = vmul.f32 %v2791_v52, %v1549_v31 }
 0x122   :  { %v1685_v37 = vadd.f32 %v2796_v55, %v1617_v36 }
 0x123   :  { %v3088_v40 = vpop.f32.mrf.mxu3 }
 0x124   :  { %v1749_v38 = vmax.f32 %v1685_v37, 0.0 }
 0x125   :  { %v1418_v41 = vpop.f32.mrf.mxu2  ;;  %v484_v48 = vpop.f32.mrf.mxu0 }
 0x126   :  { %1814 = vst.msk [vmem:[%s3530_s4 + $0x90] sm:$0xff] %vm1795_vm2, %v1749_v38  ;;  %v1550_v47 = vadd.f32 %v1418_v41, %v915_v39  ;;  %v917_v53 = vpop.f32.mrf.mxu1 }
 0x127   :  { %v918_v59 = vadd.f32 %v917_v53, %v484_v48  ;;  %v2584_v48 = vld [vmem:[%s3527_s0 + $0x100] sm:$0xff]  ;;  %v2510_v53 = vld [vmem:[%s3527_s0 + $0xb0] sm:$0xff] }
 0x128   :  { %v1618_v56 = vmul.f32 %v2791_v52, %v1550_v47  ;;  %2082 = vmatmul.msk.bf16.gmra.mxu0 %vm324_vm1, %v2541_v44  ;;  %2484 = vmatmul.msk.bf16.gmra.mxu3 %vm324_vm1, %v2582_v46  ;;  %v2543_v47 = vld [vmem:[%s3527_s0 + $0xb8] sm:$0xff] }
 0x129   :  { %2246 = vmatmul.msk.bf16.gmra.mxu1 %vm324_vm1, %v2508_v49 }
 0x12a   :  { %v1686_v57 = vadd.f32 %v2796_v55, %v1618_v56  ;;  %2476 = vmatmul.msk.bf16.gmra.mxu2 %vm324_vm1, %v2574_v50  ;;  %v2576_v56 = vld [vmem:[%s3527_s0 + $0xc0] sm:$0xff] }
 0x12b   :  { %v3112_v61 = vpop.f32.mrf.mxu3 }
 0x12c   :  { %v1750_v60 = vmax.f32 %v1686_v57, 0.0 }
 0x12d   :  { %v1421_v63 = vpop.f32.mrf.mxu2  ;;  %v486_v2 = vpop.f32.mrf.mxu0 }
 0x12e   :  { %1815 = vst.msk [vmem:[%s3530_s4 + $0x98] sm:$0xff] %vm1795_vm2, %v1750_v60  ;;  %v1551_v1 = vadd.f32 %v1421_v63, %v918_v59  ;;  %v919_v3 = vpop.f32.mrf.mxu1 }
 0x12f   :  { %v920_v9 = vadd.f32 %v919_v3, %v486_v2 }
 0x130   :  { %v1619_v5 = vmul.f32 %v2791_v52, %v1551_v1 }
 0x132   :  { %v1687_v6 = vadd.f32 %v2796_v55, %v1619_v5 }
 0x133   :  { %v3120_v10 = vpop.f32.mrf.mxu3 }
 0x134   :  { %v1751_v8 = vmax.f32 %v1687_v6, 0.0 }
 0x135   :  { %v1423_v13 = vpop.f32.mrf.mxu2  ;;  %v489_v19 = vpop.f32.mrf.mxu0 }
 0x136   :  { %1816 = vst.msk [vmem:[%s3530_s4 + $0xa0] sm:$0xff] %vm1795_vm2, %v1751_v8  ;;  %v1552_v16 = vadd.f32 %v1423_v13, %v920_v9  ;;  %v922_v23 = vpop.f32.mrf.mxu1 }
 0x137   :  { %v923_v26 = vadd.f32 %v922_v23, %v489_v19 }
 0x138   :  { %v1620_v24 = vmul.f32 %v2791_v52, %v1552_v16  ;;  %2083 = vmatmul.msk.bf16.gmra.mxu0 %vm324_vm1, %v2542_v14  ;;  %2485 = vmatmul.msk.bf16.gmra.mxu3 %vm324_vm1, %v2583_v15 }
 0x139   :  { %2247 = vmatmul.msk.bf16.gmra.mxu1 %vm324_vm1, %v2509_v21  ;;  %v2544_v21 = vld [vmem:[%s3527_s0 + $0xc0] sm:$0xff] }
 0x13a   :  { %v1688_v25 = vadd.f32 %v2796_v55, %v1620_v24  ;;  %2477 = vmatmul.msk.bf16.gmra.mxu2 %vm324_vm1, %v2575_v22  ;;  %v2585_v22 = vld [vmem:[%s3527_s0 + $0x108] sm:$0xff] }
 0x13b   :  { %v3144_v30 = vpop.f32.mrf.mxu3 }
 0x13c   :  { %v1752_v27 = vmax.f32 %v1688_v25, 0.0  ;;  %v2511_v25 = vld [vmem:[%s3527_s0 + $0xb8] sm:$0xff] }
 0x13d   :  { %v1426_v31 = vpop.f32.mrf.mxu2  ;;  %v491_v35 = vpop.f32.mrf.mxu0 }
 0x13e   :  { %1817 = vst.msk [vmem:[%s3530_s4 + $0xa8] sm:$0xff] %vm1795_vm2, %v1752_v27  ;;  %v1553_v32 = vadd.f32 %v1426_v31, %v923_v26  ;;  %v924_v36 = vpop.f32.mrf.mxu1  ;;  %v2577_v26 = vld [vmem:[%s3527_s0 + $0xc8] sm:$0xff] }
 0x13f   :  { %v925_v41 = vadd.f32 %v924_v36, %v491_v35 }
 0x140   :  { %v1621_v37 = vmul.f32 %v2791_v52, %v1553_v32 }
 0x142   :  { %v1689_v38 = vadd.f32 %v2796_v55, %v1621_v37 }
 0x143   :  { %v3152_v44 = vpop.f32.mrf.mxu3 }
 0x144   :  { %v1753_v39 = vmax.f32 %v1689_v38, 0.0 }
 0x145   :  { %v1428_v46 = vpop.f32.mrf.mxu2  ;;  %v494_v50 = vpop.f32.mrf.mxu0 }
 0x146   :  { %1818 = vst.msk [vmem:[%s3530_s4 + $0xb0] sm:$0xff] %vm1795_vm2, %v1753_v39  ;;  %v1554_v49 = vadd.f32 %v1428_v46, %v925_v41  ;;  %v927_v57 = vpop.f32.mrf.mxu1 }
 0x147   :  { %v928_v63 = vadd.f32 %v927_v57, %v494_v50  ;;  %v2545_v57 = vld [vmem:[%s3527_s0 + $0xc8] sm:$0xff] }
 0x148   :  { %v1622_v59 = vmul.f32 %v2791_v52, %v1554_v49  ;;  %2084 = vmatmul.msk.bf16.gmra.mxu0 %vm324_vm1, %v2543_v47  ;;  %2486 = vmatmul.msk.bf16.gmra.mxu3 %vm324_vm1, %v2584_v48 }
 0x149   :  { %2248 = vmatmul.msk.bf16.gmra.mxu1 %vm324_vm1, %v2510_v53 }
 0x14a   :  { %v1690_v60 = vadd.f32 %v2796_v55, %v1622_v59  ;;  %2478 = vmatmul.msk.bf16.gmra.mxu2 %vm324_vm1, %v2576_v56  ;;  %v2586_v59 = vld [vmem:[%s3527_s0 + $0x110] sm:$0xff] }
 0x14b   :  { %v3176_v2 = vpop.f32.mrf.mxu3 }
 0x14c   :  { %v1754_v1 = vmax.f32 %v1690_v60, 0.0 }
 0x14d   :  { %v1431_v3 = vpop.f32.mrf.mxu2  ;;  %v496_v6 = vpop.f32.mrf.mxu0 }
 0x14e   :  { %1819 = vst.msk [vmem:[%s3530_s4 + $0xb8] sm:$0xff] %vm1795_vm2, %v1754_v1  ;;  %v1555_v5 = vadd.f32 %v1431_v3, %v928_v63  ;;  %v929_v8 = vpop.f32.mrf.mxu1  ;;  %v2512_v1 = vld [vmem:[%s3527_s0 + $0xc0] sm:$0xff]  ;;  %v2578_v3 = vld [vmem:[%s3527_s0 + $0xd0] sm:$0xff] }
 0x14f   :  { %v930_v15 = vadd.f32 %v929_v8, %v496_v6 }
 0x150   :  { %v1623_v9 = vmul.f32 %v2791_v52, %v1555_v5 }
 0x152   :  { %v1691_v13 = vadd.f32 %v2796_v55, %v1623_v9 }
 0x153   :  { %v3184_v16 = vpop.f32.mrf.mxu3 }
 0x154   :  { %v1755_v14 = vmax.f32 %v1691_v13, 0.0 }
 0x155   :  { %v1433_v19 = vpop.f32.mrf.mxu2  ;;  %v499_v24 = vpop.f32.mrf.mxu0 }
 0x156   :  { %1820 = vst.msk [vmem:[%s3530_s4 + $0xc0] sm:$0xff] %vm1795_vm2, %v1755_v14  ;;  %v1556_v23 = vadd.f32 %v1433_v19, %v930_v15  ;;  %v932_v27 = vpop.f32.mrf.mxu1 }
 0x157   :  { %v933_v35 = vadd.f32 %v932_v27, %v499_v24 }
 0x158   :  { %v1624_v31 = vmul.f32 %v2791_v52, %v1556_v23  ;;  %2085 = vmatmul.msk.bf16.gmra.mxu0 %vm324_vm1, %v2544_v21  ;;  %2487 = vmatmul.msk.bf16.gmra.mxu3 %vm324_vm1, %v2585_v22 }
 0x159   :  { %2249 = vmatmul.msk.bf16.gmra.mxu1 %vm324_vm1, %v2511_v25 }
 0x15a   :  { %v1692_v32 = vadd.f32 %v2796_v55, %v1624_v31  ;;  %2479 = vmatmul.msk.bf16.gmra.mxu2 %vm324_vm1, %v2577_v26 }
 0x15b   :  { %v3208_v37 = vpop.f32.mrf.mxu3 }
 0x15c   :  { %v1756_v36 = vmax.f32 %v1692_v32, 0.0  ;;  %v2546_v32 = vld [vmem:[%s3527_s0 + $0xd0] sm:$0xff] }
 0x15d   :  { %v1436_v38 = vpop.f32.mrf.mxu2  ;;  %v501_v41 = vpop.f32.mrf.mxu0 }
 0x15e   :  { %1821 = vst.msk [vmem:[%s3530_s4 + $0xc8] sm:$0xff] %vm1795_vm2, %v1756_v36  ;;  %v1557_v39 = vadd.f32 %v1436_v38, %v933_v35  ;;  %v934_v46 = vpop.f32.mrf.mxu1  ;;  %v2587_v35 = vld [vmem:[%s3527_s0 + $0x118] sm:$0xff] }
 0x15f   :  { %v935_v50 = vadd.f32 %v934_v46, %v501_v41  ;;  %v2579_v41 = vld [vmem:[%s3527_s0 + $0xd8] sm:$0xff] }
 0x160   :  { %v1625_v47 = vmul.f32 %v2791_v52, %v1557_v39  ;;  %v2513_v39 = vld [vmem:[%s3527_s0 + $0xc8] sm:$0xff] }
 0x162   :  { %v1693_v48 = vadd.f32 %v2796_v55, %v1625_v47 }
 0x163   :  { %v3216_v53 = vpop.f32.mrf.mxu3 }
 0x164   :  { %v1757_v49 = vmax.f32 %v1693_v48, 0.0 }
 0x165   :  { %v1438_v56 = vpop.f32.mrf.mxu2  ;;  %v504_v63 = vpop.f32.mrf.mxu0 }
 0x166   :  { %1822 = vst.msk [vmem:[%s3530_s4 + $0xd0] sm:$0xff] %vm1795_vm2, %v1757_v49  ;;  %v1558_v60 = vadd.f32 %v1438_v56, %v935_v50  ;;  %v937_v5 = vpop.f32.mrf.mxu1 }
 0x167   :  { %v938_v9 = vadd.f32 %v937_v5, %v504_v63 }
 0x168   :  { %v1626_v6 = vmul.f32 %v2791_v52, %v1558_v60  ;;  %2086 = vmatmul.msk.bf16.gmra.mxu0 %vm324_vm1, %v2545_v57  ;;  %2488 = vmatmul.msk.bf16.gmra.mxu3 %vm324_vm1, %v2586_v59 }
 0x169   :  { %2250 = vmatmul.msk.bf16.gmra.mxu1 %vm324_vm1, %v2512_v1 }
 0x16a   :  { %v1694_v8 = vadd.f32 %v2796_v55, %v1626_v6  ;;  %2480 = vmatmul.msk.bf16.gmra.mxu2 %vm324_vm1, %v2578_v3 }
 0x16b   :  { %v3240_v14 = vpop.f32.mrf.mxu3 }
 0x16c   :  { %v1758_v13 = vmax.f32 %v1694_v8, 0.0 }
 0x16d   :  { %v1441_v15 = vpop.f32.mrf.mxu2  ;;  %v506_v21 = vpop.f32.mrf.mxu0 }
 0x16e   :  { %1823 = vst.msk [vmem:[%s3530_s4 + $0xd8] sm:$0xff] %vm1795_vm2, %v1758_v13  ;;  %v1559_v19 = vadd.f32 %v1441_v15, %v938_v9  ;;  %v939_v22 = vpop.f32.mrf.mxu1 }
 0x16f   :  { %v940_v26 = vadd.f32 %v939_v22, %v506_v21 }
 0x170   :  { %v1627_v23 = vmul.f32 %v2791_v52, %v1559_v19 }
 0x172   :  { %v1695_v24 = vadd.f32 %v2796_v55, %v1627_v23 }
 0x173   :  { %v3248_v27 = vpop.f32.mrf.mxu3 }
 0x174   :  { %v1759_v25 = vmax.f32 %v1695_v24, 0.0  ;;  %v988_v24 = vadd.f32 %v3048_v0, %v2786_v51  ;;  %v990_v0 = vadd.f32 %v3056_v12, %v2800_v62 }
 0x175   :  { %v1443_v31 = vpop.f32.mrf.mxu2  ;;  %v509_v38 = vpop.f32.mrf.mxu0 }
 0x176   :  { %1824 = vst.msk [vmem:[%s3530_s4 + $0xe0] sm:$0xff] %vm1795_vm2, %v1759_v25  ;;  %v1560_v36 = vadd.f32 %v1443_v31, %v940_v26  ;;  %v942_v46 = vpop.f32.mrf.mxu1 }
 0x177   :  { %v943_v49 = vadd.f32 %v942_v46, %v509_v38 }
 0x178   :  { %v1628_v47 = vmul.f32 %v2791_v52, %v1560_v36  ;;  %2087 = vmatmul.msk.bf16.gmra.mxu0 %vm324_vm1, %v2546_v32  ;;  %2489 = vmatmul.msk.bf16.gmra.mxu3 %vm324_vm1, %v2587_v35 }
 0x179   :  { %2251 = vmatmul.msk.bf16.gmra.mxu1 %vm324_vm1, %v2513_v39 }
 0x17a   :  { %v1696_v48 = vadd.f32 %v2796_v55, %v1628_v47  ;;  %2481 = vmatmul.msk.bf16.gmra.mxu2 %vm324_vm1, %v2579_v41 }
 0x17b   :  { %v3272_v56 = vpop.f32.mrf.mxu3 }
 0x17c   :  { %v1760_v50 = vmax.f32 %v1696_v48, 0.0 }
 0x17d   :  { %v1446_v57 = vpop.f32.mrf.mxu2  ;;  %v511_v60 = vpop.f32.mrf.mxu0 }
 0x17e   :  { %1825 = vst.msk [vmem:[%s3530_s4 + $0xe8] sm:$0xff] %vm1795_vm2, %v1760_v50  ;;  %v1561_v59 = vadd.f32 %v1446_v57, %v943_v49  ;;  %v944_v63 = vpop.f32.mrf.mxu1 }
 0x17f   :  { %v945_v6 = vadd.f32 %v944_v63, %v511_v60 }
 0x180   :  { %v1629_v1 = vmul.f32 %v2791_v52, %v1561_v59 }
 0x182   :  { %v1697_v3 = vadd.f32 %v2796_v55, %v1629_v1 }
 0x183   :  { %v3280_v8 = vpop.f32.mrf.mxu3 }
 0x184   :  { %v1761_v5 = vmax.f32 %v1697_v3, 0.0 }
 0x185   :  { %v1448_v9 = vpop.f32.mrf.mxu2  ;;  %v514_v15 = vpop.f32.mrf.mxu0 }
 0x186   :  { %1826 = vst.msk [vmem:[%s3530_s4 + $0xf0] sm:$0xff] %vm1795_vm2, %v1761_v5  ;;  %v1562_v13 = vadd.f32 %v1448_v9, %v945_v6  ;;  %v947_v19 = vpop.f32.mrf.mxu1  ;;  %v993_v9 = vadd.f32 %v3080_v29, %v2824_v11 }
 0x187   :  { %v948_v23 = vadd.f32 %v947_v19, %v514_v15 }
 0x188   :  { %v1630_v21 = vmul.f32 %v2791_v52, %v1562_v13 }
 0x18a   :  { %v1698_v22 = vadd.f32 %v2796_v55, %v1630_v21 }
 0x18b   :  { %v1491_v26 = vpop.f32.mrf.mxu3 }
 0x18c   :  { %v1762_v25 = vmax.f32 %v1698_v22, 0.0  ;;  %v1579_v32 = vadd.f32 %v1491_v26, %v988_v24 }
 0x18d   :  { %v1451_v31 = vpop.f32.mrf.mxu2  ;;  %v516_v36 = vpop.f32.mrf.mxu0 }
 0x18e   :  { %1827 = vst.msk [vmem:[%s3530_s4 + $0xf8] sm:$0xff] %vm1795_vm2, %v1762_v25  ;;  %v1563_v35 = vadd.f32 %v1451_v31, %v948_v23  ;;  %v1647_v38 = vmul.f32 %v2791_v52, %v1579_v32  ;;  %v949_v39 = vpop.f32.mrf.mxu1  ;;  %v995_v32 = vadd.f32 %v3088_v40, %v2832_v20 }
 0x18f   :  { %v950_v49 = vadd.f32 %v949_v39, %v516_v36 }
 0x190   :  { %v1631_v41 = vmul.f32 %v2791_v52, %v1563_v35  ;;  %v1715_v46 = vadd.f32 %v2796_v55, %v1647_v38 }
 0x192   :  { %v1699_v51 = vadd.f32 %v2796_v55, %v1631_v41  ;;  %v1779_v47 = vmax.f32 %v1715_v46, 0.0 }
 0x193   :  { %v1493_v50 = vpop.f32.mrf.mxu3 }
 0x194   :  { %v1763_v48 = vmax.f32 %v1699_v51, 0.0  ;;  %1844 = vst.msk [vmem:[%s3530_s4 + $0x180] sm:$0xff] %vm1795_vm2, %v1779_v47  ;;  %v1580_v59 = vadd.f32 %v1493_v50, %v990_v0 }
 0x195   :  { %v1453_v57 = vpop.f32.mrf.mxu2  ;;  %v519_v63 = vpop.f32.mrf.mxu0 }
 0x196   :  { %1828 = vst.msk [vmem:[%s3530_s4 + $0x100] sm:$0xff] %vm1795_vm2, %v1763_v48  ;;  %v1564_v60 = vadd.f32 %v1453_v57, %v950_v49  ;;  %v1648_v62 = vmul.f32 %v2791_v52, %v1580_v59  ;;  %v952_v12 = vpop.f32.mrf.mxu1  ;;  %v998_v57 = vadd.f32 %v3112_v61, %v2856_v33  ;;  %v3353_v33 = vld [vmem:[%s3528_s2] ss:$0 sm:$0xff] }
 0x197   :  { %v953_v6 = vadd.f32 %v952_v12, %v519_v63 }
 0x198   :  { %v1632_v1 = vmul.f32 %v2791_v52, %v1564_v60  ;;  %v1716_v3 = vadd.f32 %v2796_v55, %v1648_v62 }
 0x19a   :  { %v1700_v5 = vadd.f32 %v2796_v55, %v1632_v1  ;;  %v1780_v13 = vmax.f32 %v1716_v3, 0.0 }
 0x19b   :  { %v1496_v19 = vpop.f32.mrf.mxu3 }
 0x19c   :  { %v1764_v15 = vmax.f32 %v1700_v5, 0.0  ;;  %1845 = vst.msk [vmem:[%s3530_s4 + $0x188] sm:$0xff] %vm1795_vm2, %v1780_v13  ;;  %v1581_v22 = vadd.f32 %v1496_v19, %v993_v9  ;;  %v3360_v5 = vld [vmem:[%s3529_s3] ss:$0 sm:$0xff]  ;;  %v1000_v13 = vadd.f32 %v3120_v10, %v2864_v42 }
 0x19d   :  { %v1456_v21 = vpop.f32.mrf.mxu2  ;;  %v521_v24 = vpop.f32.mrf.mxu0 }
 0x19e   :  { %1829 = vst.msk [vmem:[%s3530_s4 + $0x108] sm:$0xff] %vm1795_vm2, %v1764_v15  ;;  %v1565_v23 = vadd.f32 %v1456_v21, %v953_v6  ;;  %v1649_v25 = vmul.f32 %v2791_v52, %v1581_v22  ;;  %v954_v11 = vpop.f32.mrf.mxu1 }
 0x19f   :  { %v955_v38 = vadd.f32 %v954_v11, %v521_v24 }
 0x1a0   :  { %v1633_v29 = vmul.f32 %v2791_v52, %v1565_v23  ;;  %v1717_v26 = vadd.f32 %v2796_v55, %v1649_v25 }
 0x1a2   :  { %v1701_v31 = vadd.f32 %v2796_v55, %v1633_v29  ;;  %v1781_v35 = vmax.f32 %v1717_v26, 0.0 }
 0x1a3   :  { %v1498_v39 = vpop.f32.mrf.mxu3 }
 0x1a4   :  { %v1765_v36 = vmax.f32 %v1701_v31, 0.0  ;;  %1846 = vst.msk [vmem:[%s3530_s4 + $0x190] sm:$0xff] %vm1795_vm2, %v1781_v35  ;;  %v1582_v46 = vadd.f32 %v1498_v39, %v995_v32  ;;  %v1003_v35 = vadd.f32 %v3144_v30, %v2888_v58 }
 0x1a5   :  { %v1458_v41 = vpop.f32.mrf.mxu2  ;;  %v524_v0 = vpop.f32.mrf.mxu0 }
 0x1a6   :  { %1830 = vst.msk [vmem:[%s3530_s4 + $0x110] sm:$0xff] %vm1795_vm2, %v1765_v36  ;;  %v1566_v51 = vadd.f32 %v1458_v41, %v955_v38  ;;  %v1650_v20 = vmul.f32 %v2791_v52, %v1582_v46  ;;  %v957_v40 = vpop.f32.mrf.mxu1 }
 0x1a7   :  { %v958_v50 = vadd.f32 %v957_v40, %v524_v0 }
 0x1a8   :  { %v1634_v47 = vmul.f32 %v2791_v52, %v1566_v51  ;;  %v1718_v48 = vadd.f32 %v2796_v55, %v1650_v20 }
 0x1aa   :  { %v1702_v49 = vadd.f32 %v2796_v55, %v1634_v47  ;;  %v1782_v59 = vmax.f32 %v1718_v48, 0.0  ;;  %v1005_v48 = vadd.f32 %v3152_v44, %v2896_v4 }
 0x1ab   :  { %v1501_v63 = vpop.f32.mrf.mxu3 }
 0x1ac   :  { %v1766_v60 = vmax.f32 %v1702_v49, 0.0  ;;  %1847 = vst.msk [vmem:[%s3530_s4 + $0x198] sm:$0xff] %vm1795_vm2, %v1782_v59  ;;  %v1583_v12 = vadd.f32 %v1501_v63, %v998_v57 }
 0x1ad   :  { %v1461_v62 = vpop.f32.mrf.mxu2  ;;  %v526_v55 = vpop.f32.mrf.mxu0 }
 0x1ae   :  { %1831 = vst.msk [vmem:[%s3530_s4 + $0x118] sm:$0xff] %vm1795_vm2, %v1766_v60  ;;  %v1567_v52 = vadd.f32 %v1461_v62, %v958_v50  ;;  %v1651_v61 = vmul.f32 %v3353_v33, %v1583_v12  ;;  %v959_v1 = vpop.f32.mrf.mxu1 }
 0x1af   :  { %v960_v21 = vadd.f32 %v959_v1, %v526_v55 }
 0x1b0   :  { %v1635_v3 = vmul.f32 %v3353_v33, %v1567_v52  ;;  %v1719_v6 = vadd.f32 %v3360_v5, %v1651_v61 }
 0x1b2   :  { %v1703_v9 = vadd.f32 %v3360_v5, %v1635_v3  ;;  %v1783_v15 = vmax.f32 %v1719_v6, 0.0  ;;  %v1008_v3 = vadd.f32 %v3176_v2, %v2920_v18 }
 0x1b3   :  { %v1503_v22 = vpop.f32.mrf.mxu3 }
 0x1b4   :  { %v1767_v19 = vmax.f32 %v1703_v9, 0.0  ;;  %1848 = vst.msk [vmem:[%s3530_s4 + $0x1a0] sm:$0xff] %vm1795_vm2, %v1783_v15  ;;  %v1584_v24 = vadd.f32 %v1503_v22, %v1000_v13 }
 0x1b5   :  { %v1463_v23 = vpop.f32.mrf.mxu2  ;;  %v529_v11 = vpop.f32.mrf.mxu0 }
 0x1b6   :  { %1832 = vst.msk [vmem:[%s3530_s4 + $0x120] sm:$0xff] %vm1795_vm2, %v1767_v19  ;;  %v1568_v25 = vadd.f32 %v1463_v23, %v960_v21  ;;  %v1652_v42 = vmul.f32 %v3353_v33, %v1584_v24  ;;  %v962_v10 = vpop.f32.mrf.mxu1 }
 0x1b7   :  { %v963_v32 = vadd.f32 %v962_v10, %v529_v11  ;;  %v1010_v11 = vadd.f32 %v3184_v16, %v2928_v28 }
 0x1b8   :  { %v1636_v29 = vmul.f32 %v3353_v33, %v1568_v25  ;;  %v1720_v26 = vadd.f32 %v3360_v5, %v1652_v42 }
 0x1ba   :  { %v1704_v31 = vadd.f32 %v3360_v5, %v1636_v29  ;;  %v1784_v36 = vmax.f32 %v1720_v26, 0.0 }
 0x1bb   :  { %v1506_v39 = vpop.f32.mrf.mxu3 }
 0x1bc   :  { %v1768_v38 = vmax.f32 %v1704_v31, 0.0  ;;  %1849 = vst.msk [vmem:[%s3530_s4 + $0x1a8] sm:$0xff] %vm1795_vm2, %v1784_v36  ;;  %v1585_v46 = vadd.f32 %v1506_v39, %v1003_v35 }
 0x1bd   :  { %v1466_v41 = vpop.f32.mrf.mxu2  ;;  %v531_v0 = vpop.f32.mrf.mxu0 }
 0x1be   :  { %1833 = vst.msk [vmem:[%s3530_s4 + $0x128] sm:$0xff] %vm1795_vm2, %v1768_v38  ;;  %v1569_v51 = vadd.f32 %v1466_v41, %v963_v32  ;;  %v1653_v20 = vmul.f32 %v3353_v33, %v1585_v46  ;;  %v964_v58 = vpop.f32.mrf.mxu1 }
 0x1bf   :  { %v965_v57 = vadd.f32 %v964_v58, %v531_v0 }
 0x1c0   :  { %v1637_v30 = vmul.f32 %v3353_v33, %v1569_v51  ;;  %v1721_v40 = vadd.f32 %v3360_v5, %v1653_v20  ;;  %v1013_v51 = vadd.f32 %v3208_v37, %v2952_v43 }
 0x1c2   :  { %v1705_v47 = vadd.f32 %v3360_v5, %v1637_v30  ;;  %v1785_v49 = vmax.f32 %v1721_v40, 0.0 }
 0x1c3   :  { %v1508_v59 = vpop.f32.mrf.mxu3 }
 0x1c4   :  { %v1769_v50 = vmax.f32 %v1705_v47, 0.0  ;;  %1850 = vst.msk [vmem:[%s3530_s4 + $0x1b0] sm:$0xff] %vm1795_vm2, %v1785_v49  ;;  %v1586_v63 = vadd.f32 %v1508_v59, %v1005_v48  ;;  %v1015_v59 = vadd.f32 %v3216_v53, %v2960_v54 }
 0x1c5   :  { %v1468_v60 = vpop.f32.mrf.mxu2  ;;  %v534_v12 = vpop.f32.mrf.mxu0 }
 0x1c6   :  { %1834 = vst.msk [vmem:[%s3530_s4 + $0x130] sm:$0xff] %vm1795_vm2, %v1769_v50  ;;  %v1570_v62 = vadd.f32 %v1468_v60, %v965_v57  ;;  %v1654_v4 = vmul.f32 %v3353_v33, %v1586_v63  ;;  %v967_v44 = vpop.f32.mrf.mxu1 }
 0x1c7   :  { %v968_v1 = vadd.f32 %v967_v44, %v534_v12 }
 0x1c8   :  { %v1638_v52 = vmul.f32 %v3353_v33, %v1570_v62  ;;  %v1722_v55 = vadd.f32 %v3360_v5, %v1654_v4 }
 0x1ca   :  { %v1706_v61 = vadd.f32 %v3360_v5, %v1638_v52  ;;  %v1786_v6 = vmax.f32 %v1722_v55, 0.0 }
 0x1cb   :  { %v1511_v13 = vpop.f32.mrf.mxu3 }
 0x1cc   :  { %v1770_v9 = vmax.f32 %v1706_v61, 0.0  ;;  %1851 = vst.msk [vmem:[%s3530_s4 + $0x1b8] sm:$0xff] %vm1795_vm2, %v1786_v6  ;;  %v1587_v19 = vadd.f32 %v1511_v13, %v1008_v3 }
 0x1cd   :  { %v1471_v15 = vpop.f32.mrf.mxu2  ;;  %v536_v22 = vpop.f32.mrf.mxu0 }
 0x1ce   :  { %1835 = vst.msk [vmem:[%s3530_s4 + $0x138] sm:$0xff] %vm1795_vm2, %v1770_v9  ;;  %v1571_v21 = vadd.f32 %v1471_v15, %v968_v1  ;;  %v1655_v23 = vmul.f32 %v3353_v33, %v1587_v19  ;;  %v969_v18 = vpop.f32.mrf.mxu1  ;;  %v1018_v9 = vadd.f32 %v3240_v14, %v2984_v7 }
 0x1cf   :  { %v970_v29 = vadd.f32 %v969_v18, %v536_v22 }
 0x1d0   :  { %v1639_v2 = vmul.f32 %v3353_v33, %v1571_v21  ;;  %v1723_v24 = vadd.f32 %v3360_v5, %v1655_v23 }
 0x1d2   :  { %v1707_v25 = vadd.f32 %v3360_v5, %v1639_v2  ;;  %v1787_v42 = vmax.f32 %v1723_v24, 0.0 }
 0x1d3   :  { %v1513_v26 = vpop.f32.mrf.mxu3 }
 0x1d4   :  { %v1771_v10 = vmax.f32 %v1707_v25, 0.0  ;;  %1852 = vst.msk [vmem:[%s3530_s4 + $0x1c0] sm:$0xff] %vm1795_vm2, %v1787_v42  ;;  %v1588_v32 = vadd.f32 %v1513_v26, %v1010_v11  ;;  %v1020_v11 = vadd.f32 %v3248_v27, %v2992_v17 }
 0x1d5   :  { %v1473_v31 = vpop.f32.mrf.mxu2  ;;  %v539_v36 = vpop.f32.mrf.mxu0 }
 0x1d6   :  { %1836 = vst.msk [vmem:[%s3530_s4 + $0x140] sm:$0xff] %vm1795_vm2, %v1771_v10  ;;  %v1572_v35 = vadd.f32 %v1473_v31, %v970_v29  ;;  %v1656_v28 = vmul.f32 %v3353_v33, %v1588_v32  ;;  %v972_v16 = vpop.f32.mrf.mxu1 }
 0x1d7   :  { %v973_v46 = vadd.f32 %v972_v16, %v539_v36 }
 0x1d8   :  { %v1640_v38 = vmul.f32 %v3353_v33, %v1572_v35  ;;  %v1724_v39 = vadd.f32 %v3360_v5, %v1656_v28 }
 0x1da   :  { %v1708_v41 = vadd.f32 %v3360_v5, %v1640_v38  ;;  %v1788_v0 = vmax.f32 %v1724_v39, 0.0 }
 0x1db   :  { %v1516_v58 = vpop.f32.mrf.mxu3 }
 0x1dc   :  { %v1772_v20 = vmax.f32 %v1708_v41, 0.0  ;;  %1853 = vst.msk [vmem:[%s3530_s4 + $0x1c8] sm:$0xff] %vm1795_vm2, %v1788_v0  ;;  %v1589_v40 = vadd.f32 %v1516_v58, %v1013_v51  ;;  %v1023_v41 = vadd.f32 %v3272_v56, %v3016_v34 }
 0x1dd   :  { %v1476_v30 = vpop.f32.mrf.mxu2  ;;  %v541_v48 = vpop.f32.mrf.mxu0 }
 0x1de   :  { %1837 = vst.msk [vmem:[%s3530_s4 + $0x148] sm:$0xff] %vm1795_vm2, %v1772_v20  ;;  %v1573_v47 = vadd.f32 %v1476_v30, %v973_v46  ;;  %v1657_v49 = vmul.f32 %v3353_v33, %v1589_v40  ;;  %v974_v43 = vpop.f32.mrf.mxu1 }
 0x1df   :  { %v975_v62 = vadd.f32 %v974_v43, %v541_v48  ;;  %v1025_v43 = vadd.f32 %v3280_v8, %v3024_v45 }
 0x1e0   :  { %v1641_v37 = vmul.f32 %v3353_v33, %v1573_v47  ;;  %v1725_v50 = vadd.f32 %v3360_v5, %v1657_v49 }
 0x1e2   :  { %v1709_v57 = vadd.f32 %v3360_v5, %v1641_v37  ;;  %v1789_v60 = vmax.f32 %v1725_v50, 0.0 }
 0x1e3   :  { %v1518_v12 = vpop.f32.mrf.mxu3 }
 0x1e4   :  { %v1773_v63 = vmax.f32 %v1709_v57, 0.0  ;;  %1854 = vst.msk [vmem:[%s3530_s4 + $0x1d0] sm:$0xff] %vm1795_vm2, %v1789_v60  ;;  %v1590_v44 = vadd.f32 %v1518_v12, %v1015_v59 }
 0x1e5   :  { %v1478_v4 = vpop.f32.mrf.mxu2  ;;  %v544_v55 = vpop.f32.mrf.mxu0 }
 0x1e6   :  { %1838 = vst.msk [vmem:[%s3530_s4 + $0x150] sm:$0xff] %vm1795_vm2, %v1773_v63  ;;  %v1574_v52 = vadd.f32 %v1478_v4, %v975_v62  ;;  %v1658_v54 = vmul.f32 %v3353_v33, %v1590_v44  ;;  %v977_v53 = vpop.f32.mrf.mxu1 }
 0x1e7   :  { %v978_v6 = vadd.f32 %v977_v53, %v544_v55 }
 0x1e8   :  { %v1642_v61 = vmul.f32 %v3353_v33, %v1574_v52  ;;  %v1726_v1 = vadd.f32 %v3360_v5, %v1658_v54 }
 0x1ea   :  { %v1710_v3 = vadd.f32 %v3360_v5, %v1642_v61  ;;  %v1790_v13 = vmax.f32 %v1726_v1, 0.0 }
 0x1eb   :  { %v1521_v19 = vpop.f32.mrf.mxu3 }
 0x1ec   :  { %v1774_v15 = vmax.f32 %v1710_v3, 0.0  ;;  %1855 = vst.msk [vmem:[%s3530_s4 + $0x1d8] sm:$0xff] %vm1795_vm2, %v1790_v13  ;;  %v1591_v22 = vadd.f32 %v1521_v19, %v1018_v9 }
 0x1ed   :  { %v1481_v21 = vpop.f32.mrf.mxu2  ;;  %v546_v18 = vpop.f32.mrf.mxu0 }
 0x1ee   :  { %1839 = vst.msk [vmem:[%s3530_s4 + $0x158] sm:$0xff] %vm1795_vm2, %v1774_v15  ;;  %v1575_v23 = vadd.f32 %v1481_v21, %v978_v6  ;;  %v1659_v2 = vmul.f32 %v3353_v33, %v1591_v22  ;;  %v979_v7 = vpop.f32.mrf.mxu1 }
 0x1ef   :  { %v980_v29 = vadd.f32 %v979_v7, %v546_v18 }
 0x1f0   :  { %v1643_v14 = vmul.f32 %v3353_v33, %v1575_v23  ;;  %v1727_v24 = vadd.f32 %v3360_v5, %v1659_v2 }
 0x1f2   :  { %v1711_v25 = vadd.f32 %v3360_v5, %v1643_v14  ;;  %v1791_v42 = vmax.f32 %v1727_v24, 0.0 }
 0x1f3   :  { %v1523_v26 = vpop.f32.mrf.mxu3 }
 0x1f4   :  { %v1775_v10 = vmax.f32 %v1711_v25, 0.0  ;;  %1856 = vst.msk [vmem:[%s3530_s4 + $0x1e0] sm:$0xff] %vm1795_vm2, %v1791_v42  ;;  %v1592_v32 = vadd.f32 %v1523_v26, %v1020_v11 }
 0x1f5   :  { %v1483_v31 = vpop.f32.mrf.mxu2  ;;  %v549_v17 = vpop.f32.mrf.mxu0 }
 0x1f6   :  { %1840 = vst.msk [vmem:[%s3530_s4 + $0x160] sm:$0xff] %vm1795_vm2, %v1775_v10  ;;  %v1576_v35 = vadd.f32 %v1483_v31, %v980_v29  ;;  %v1660_v36 = vmul.f32 %v3353_v33, %v1592_v32  ;;  %v982_v27 = vpop.f32.mrf.mxu1 }
 0x1f7   :  { %v983_v39 = vadd.f32 %v982_v27, %v549_v17 }
 0x1f8   :  { %v1644_v28 = vmul.f32 %v3353_v33, %v1576_v35  ;;  %v1728_v16 = vadd.f32 %v3360_v5, %v1660_v36 }
 0x1fa   :  { %v1712_v38 = vadd.f32 %v3360_v5, %v1644_v28  ;;  %v1792_v46 = vmax.f32 %v1728_v16, 0.0 }
 0x1fb   :  { %v1526_v0 = vpop.f32.mrf.mxu3 }
 0x1fc   :  { %v1776_v51 = vmax.f32 %v1712_v38, 0.0  ;;  %1857 = vst.msk [vmem:[%s3530_s4 + $0x1e8] sm:$0xff] %vm1795_vm2, %v1792_v46  ;;  %v1593_v58 = vadd.f32 %v1526_v0, %v1023_v41 }
 0x1fd   :  { %v1486_v20 = vpop.f32.mrf.mxu2  ;;  %v551_v47 = vpop.f32.mrf.mxu0 }
 0x1fe   :  { %1841 = vst.msk [vmem:[%s3530_s4 + $0x168] sm:$0xff] %vm1795_vm2, %v1776_v51  ;;  %v1577_v30 = vadd.f32 %v1486_v20, %v983_v39  ;;  %v1661_v40 = vmul.f32 %v3353_v33, %v1593_v58  ;;  %v984_v48 = vpop.f32.mrf.mxu1 }
 0x1ff   :  { %v985_v57 = vadd.f32 %v984_v48, %v551_v47 }
 0x200   :  { %v1645_v34 = vmul.f32 %v3353_v33, %v1577_v30  ;;  %v1729_v56 = vadd.f32 %v3360_v5, %v1661_v40 }
 0x202   :  { %v1713_v49 = vadd.f32 %v3360_v5, %v1645_v34  ;;  %v1793_v37 = vmax.f32 %v1729_v56, 0.0 }
 0x203   :  { %v1528_v59 = vpop.f32.mrf.mxu3 }
 0x204   :  { %v1777_v50 = vmax.f32 %v1713_v49, 0.0  ;;  %1858 = vst.msk [vmem:[%s3530_s4 + $0x1f0] sm:$0xff] %vm1795_vm2, %v1793_v37  ;;  %v1594_v63 = vadd.f32 %v1528_v59, %v1025_v43 }
 0x205   :  { %v1488_v60 = vpop.f32.mrf.mxu2 }
 0x206   :  { %1842 = vst.msk [vmem:[%s3530_s4 + $0x170] sm:$0xff] %vm1795_vm2, %v1777_v50  ;;  %v1578_v62 = vadd.f32 %v1488_v60, %v985_v57  ;;  %v1662_v12 = vmul.f32 %v3353_v33, %v1594_v63 }
 0x208   :  { %v1646_v45 = vmul.f32 %v3353_v33, %v1578_v62  ;;  %v1730_v8 = vadd.f32 %v3360_v5, %v1662_v12 }
 0x20a   :  { %v1714_v4 = vadd.f32 %v3360_v5, %v1646_v45  ;;  %v1794_v44 = vmax.f32 %v1730_v8, 0.0 }
 0x20c   :  { %v1778_v52 = vmax.f32 %v1714_v4, 0.0  ;;  %1859 = vst.msk [vmem:[%s3530_s4 + $0x1f8] sm:$0xff] %vm1795_vm2, %v1794_v44 }
 0x20e   :  { %1843 = vst.msk [vmem:[%s3530_s4 + $0x178] sm:$0xff] %vm1795_vm2, %v1778_v52 }

</bundles_post_ra>
